<compile_context>
chip_gen: v7x
topology: tpu7x:2x2x1
jax: 0.10.0
libtpu: 0.0.40
codegen_flags: <defaults>
</compile_context>

<pallas_src>
import functools

import jax
import jax.numpy as jnp
from jax.experimental import pallas as pl
from jax.experimental.pallas import tpu as pltpu


# ----------------------------------------------------------------------------
# Fused kernel: batch-tiled projections + attention (all heads) + fc + LayerNorm
# ----------------------------------------------------------------------------
def _mha_kernel(q_ref, k_ref, v_ref, mask_ref,
                wq_ref, wk_ref, wv_ref, fcw_ref, fcb_ref, g_ref, beta_ref,
                out_ref, attn_ref=None, *,
                matmul_dtype, mask_is_bool, temperature, eps):
    tb, len_q, d_model = q_ref.shape
    len_k = k_ref.shape[1]
    n_head, _, d_k = wq_ref.shape
    d_v = wv_ref.shape[2]

    q = q_ref[...]                                       # (TB, Lq, D) f32 (residual)
    q2 = q.reshape(tb * len_q, d_model)
    k2 = k_ref[...].reshape(tb * len_k, d_model)
    v2 = v_ref[...].reshape(tb * len_k, d_model)

    # Cast MXU operands once (k/v are usually already bf16 from the boundary).
    qc = q2.astype(matmul_dtype)
    kc = k2.astype(matmul_dtype)
    vc = v2.astype(matmul_dtype)

    # Additive mask bias, built in-kernel from the 1-byte mask stream.
    m = mask_ref[...]
    if mask_is_bool:
        bias = m.astype(jnp.float32) * jnp.float32(-1e10)        # (TB, Lq, Lk)
    else:
        bias = m.astype(jnp.float32)                             # torch float-mask add

    inv_temp = jnp.float32(1.0 / temperature)

    # fc bias + residual start the accumulation (f32 VPU math).
    y = q2 + fcb_ref[...]                                        # (TB*Lq, D)

    # n_head is small & static; per-head access is a leading-dim index on the
    # head-major weight refs (no lane slices, no per-head relayouts).
    for h in range(n_head):
        qh = jnp.dot(qc, wq_ref[h], preferred_element_type=matmul_dtype)
        kh = jnp.dot(kc, wk_ref[h], preferred_element_type=matmul_dtype)
        vh = jnp.dot(vc, wv_ref[h], preferred_element_type=matmul_dtype)
        qh = qh.reshape(tb, len_q, d_k)
        kh = kh.reshape(tb, len_k, d_k)
        vh = vh.reshape(tb, len_k, d_v)

        # Batched over TB: no kh.T materialized, f32 accumulation on the MXU.
        scores = jnp.einsum("bqd,bkd->bqk", qh, kh,
                            preferred_element_type=jnp.float32)
        scores = scores * inv_temp + bias

        # Exact softmax (rows sum to 1, matches torch); all f32.
        e = jnp.exp(scores - jnp.max(scores, axis=-1, keepdims=True))
        attn = e / jnp.sum(e, axis=-1, keepdims=True)

        if attn_ref is not None:
            attn_ref[h] = attn.astype(attn_ref.dtype)

        ctx = jnp.einsum("bqk,bkv->bqv", attn.astype(matmul_dtype), vh,
                         preferred_element_type=jnp.float32)     # (TB, Lq, d_v)
        y = y + jnp.dot(ctx.reshape(tb * len_q, d_v).astype(matmul_dtype),
                        fcw_ref[h], preferred_element_type=jnp.float32)

    # LayerNorm epilogue (f32 VPU math on every TPU generation).
    mu = jnp.mean(y, axis=-1, keepdims=True)
    var = jnp.mean((y - mu) * (y - mu), axis=-1, keepdims=True)
    yn = (y - mu) * jax.lax.rsqrt(var + eps) * g_ref[...] + beta_ref[...]
    out_ref[...] = yn.reshape(tb, len_q, d_model).astype(out_ref.dtype)


# ----------------------------------------------------------------------------
# Helpers: batch-tile choice and VMEM budget
# ----------------------------------------------------------------------------
def _choose_batch_tile(sz_b, len_q):
    # Smallest divisor TB of sz_b with TB*len_q >= 256 (MXU-friendly M dim);
    # prefer leaving >= 2 grid steps so both v7x TensorCores get work.
    target = min(sz_b, max(1, -(-256 // max(len_q, 1))))
    candidates = [tb for tb in range(1, sz_b + 1)
                  if sz_b % tb == 0 and tb >= target]
    for tb in candidates:
        if sz_b // tb >= 2:
            return tb
    return candidates[0] if candidates else sz_b


def _vmem_limit_bytes(tb, len_q, len_k, d_model, n_head, d_k, d_v,
                      matmul_itemsize, mask_itemsize, return_attn, attn_itemsize):
    f32 = 4
    act_in = (tb * len_q * d_model * f32                      # q (f32, residual)
              + 2 * tb * len_k * d_model * matmul_itemsize    # k, v
              + tb * len_q * len_k * mask_itemsize)           # mask stream
    act_out = tb * len_q * d_model * f32
    if return_attn:
        act_out += n_head * tb * len_q * len_k * attn_itemsize
    weights = (n_head * d_model * (2 * d_k + 2 * d_v)) * matmul_itemsize \
        + 3 * d_model * f32
    # 2x for double-buffered pipelining + headroom for in-kernel temporaries.
    budget = 2 * (act_in + act_out + weights) + (8 << 20)
    # Size against v7x: 64 MiB physical VMEM (32 MiB default scoped limit).
    return int(min(max(budget, 32 << 20), 64 << 20))


# ----------------------------------------------------------------------------
# Wrapper
# ----------------------------------------------------------------------------
def multi_head_attention_forward(q, k, v, mask, params, *, n_head, d_k, d_v,
                                 matmul_dtype=jnp.bfloat16,
                                 return_attn=True, attn_dtype=jnp.float32,
                                 batch_tile=None):
    sz_b, len_q, d_model = q.shape
    len_k = k.shape[1]
    temperature = float(d_k) ** 0.5
    matmul_dtype = jnp.dtype(matmul_dtype)
    attn_dtype = jnp.dtype(attn_dtype)

    if batch_tile is None:
        batch_tile = _choose_batch_tile(sz_b, len_q)
    assert sz_b % batch_tile == 0, "batch_tile must divide the batch size"
    tb = batch_tile

    # Mask streams in as 1 byte/element; the -1e10 bias is built in-kernel.
    # (Additive -1e10 == masked_fill only if every row keeps >= 1 unmasked key,
    #  which the TGAT neighbor mask guarantees; asserted in the test path.)
    if mask is None:
        mask_in, mask_is_bool = jnp.zeros((sz_b, len_q, len_k), jnp.int8), True
    elif mask.dtype == jnp.bool_:
        mask_in, mask_is_bool = mask.astype(jnp.int8), True
    else:
        mask_in, mask_is_bool = mask.astype(jnp.float32), False

    # MXU weight operands cast once at the boundary; q stays f32 (residual/LN),
    # k/v are only ever MXU inputs so they ride in matmul_dtype.
    wq = params["wq_h"].astype(matmul_dtype)      # (n_head, d_model, d_k)
    wk = params["wk_h"].astype(matmul_dtype)      # (n_head, d_model, d_k)
    wv = params["wv_h"].astype(matmul_dtype)      # (n_head, d_model, d_v)
    fcw = params["fcw_h"].astype(matmul_dtype)    # (n_head, d_v, d_model)
    k_in = k if matmul_dtype == jnp.float32 else k.astype(matmul_dtype)
    v_in = v if matmul_dtype == jnp.float32 else v.astype(matmul_dtype)

    out_shape = [jax.ShapeDtypeStruct((sz_b, len_q, d_model), jnp.float32)]
    out_specs = [pl.BlockSpec((tb, len_q, d_model), lambda b: (b, 0, 0))]
    if return_attn:
        out_shape.append(
            jax.ShapeDtypeStruct((n_head, sz_b, len_q, len_k), attn_dtype))
        out_specs.append(
            pl.BlockSpec((n_head, tb, len_q, len_k), lambda b: (0, b, 0, 0)))

    in_specs = [
        pl.BlockSpec((tb, len_q, d_model), lambda b: (b, 0, 0)),     # q (f32)
        pl.BlockSpec((tb, len_k, d_model), lambda b: (b, 0, 0)),     # k
        pl.BlockSpec((tb, len_k, d_model), lambda b: (b, 0, 0)),     # v
        pl.BlockSpec((tb, len_q, len_k), lambda b: (b, 0, 0)),       # mask (int8/f32)
        # Grid-invariant weights / norm params: DMA'd once, kept resident.
        pl.BlockSpec((n_head, d_model, d_k), lambda b: (0, 0, 0)),   # wq (head-major)
        pl.BlockSpec((n_head, d_model, d_k), lambda b: (0, 0, 0)),   # wk
        pl.BlockSpec((n_head, d_model, d_v), lambda b: (0, 0, 0)),   # wv
        pl.BlockSpec((n_head, d_v, d_model), lambda b: (0, 0, 0)),   # fc weight
        pl.BlockSpec((1, d_model), lambda b: (0, 0)),                # fc bias
        pl.BlockSpec((1, d_model), lambda b: (0, 0)),                # ln gamma
        pl.BlockSpec((1, d_model), lambda b: (0, 0)),                # ln beta
    ]

    flops = 2 * sz_b * (
        len_q * d_model * n_head * d_k            # q projection
        + len_k * d_model * n_head * d_k          # k projection
        + len_k * d_model * n_head * d_v          # v projection
        + n_head * len_q * len_k * (d_k + d_v)    # scores + context
        + len_q * n_head * d_v * d_model)         # fc
    bytes_accessed = (q.nbytes + k_in.nbytes + v_in.nbytes + mask_in.nbytes
                      + wq.nbytes + wk.nbytes + wv.nbytes + fcw.nbytes
                      + params["fc_b"].nbytes + params["ln_g"].nbytes
                      + params["ln_b"].nbytes
                      + sz_b * len_q * d_model * 4
                      + (n_head * sz_b * len_q * len_k * attn_dtype.itemsize
                         if return_attn else 0))
    cost = pl.CostEstimate(flops=int(flops),
                           transcendentals=int(sz_b * n_head * len_q * len_k),
                           bytes_accessed=int(bytes_accessed))

    vmem_limit = _vmem_limit_bytes(
        tb, len_q, len_k, d_model, n_head, d_k, d_v,
        matmul_dtype.itemsize, mask_in.dtype.itemsize,
        return_attn, attn_dtype.itemsize)

    kernel = functools.partial(
        _mha_kernel, matmul_dtype=matmul_dtype, mask_is_bool=mask_is_bool,
        temperature=temperature, eps=1e-5)

    outs = pl.pallas_call(
        kernel,
        out_shape=tuple(out_shape),
        grid_spec=pltpu.PrefetchScalarGridSpec(
            num_scalar_prefetch=0,
            grid=(sz_b // tb,),
            in_specs=in_specs,
            out_specs=out_specs,
        ),
        compiler_params=pltpu.CompilerParams(
            dimension_semantics=("parallel",),
            vmem_limit_bytes=vmem_limit),
        cost_estimate=cost,
    )(q, k_in, v_in, mask_in, wq, wk, wv, fcw,
      params["fc_b"], params["ln_g"], params["ln_b"])

    if return_attn:
        output, attn4 = outs
        # Head-major flatten matches torch attn.view(n_head*sz_b, len_q, len_k);
        # contiguous reshape, no transpose / HBM round trip.
        return output, attn4.reshape(n_head * sz_b, len_q, len_k)
    (output,) = outs
    return output, None


# ----------------------------------------------------------------------------
# Deterministic parameter construction (mirrors nn.Module __init__ shapes)
# ----------------------------------------------------------------------------
def init_params(key, n_head, d_model, d_k, d_v):
    k1, k2, k3, k4, k5 = jax.random.split(key, 5)
    std_qk = (2.0 / (d_model + d_k)) ** 0.5
    std_v = (2.0 / (d_model + d_v)) ** 0.5

    # torch Linear weight is (out, in); projection applies x @ W.T
    w_qs = std_qk * jax.random.normal(k1, (n_head * d_k, d_model), jnp.float32)
    w_ks = std_qk * jax.random.normal(k2, (n_head * d_k, d_model), jnp.float32)
    w_vs = std_v * jax.random.normal(k3, (n_head * d_v, d_model), jnp.float32)

    xavier_std = (2.0 / (d_model + n_head * d_v)) ** 0.5
    fc_w = xavier_std * jax.random.normal(k4, (d_model, n_head * d_v), jnp.float32)
    fc_b = 0.01 * jax.random.normal(k5, (1, d_model), jnp.float32)

    return {
        # Head-major layouts: per-head access in the kernel is a free leading-dim
        # index (no 16-lane column slices).
        "wq_h": jnp.transpose(w_qs.reshape(n_head, d_k, d_model), (0, 2, 1)),
        "wk_h": jnp.transpose(w_ks.reshape(n_head, d_k, d_model), (0, 2, 1)),
        "wv_h": jnp.transpose(w_vs.reshape(n_head, d_v, d_model), (0, 2, 1)),
        "fcw_h": fc_w.T.reshape(n_head, d_v, d_model),
        "fc_b": fc_b,                                   # (1, d_model)
        "ln_g": jnp.ones((1, d_model), jnp.float32),
        "ln_b": jnp.zeros((1, d_model), jnp.float32),
    }


# ----------------------------------------------------------------------------
# Pure-JAX reference (torch semantics) for correctness checks
# ----------------------------------------------------------------------------
def reference_forward(q, k, v, mask, params, *, n_head, d_k, d_v):
    sz_b, len_q, _ = q.shape
    len_k = k.shape[1]
    temperature = float(d_k) ** 0.5
    hp = jax.lax.Precision.HIGHEST
    qh = jnp.einsum("bld,hdk->hblk", q, params["wq_h"], precision=hp)
    kh = jnp.einsum("bld,hdk->hblk", k, params["wk_h"], precision=hp)
    vh = jnp.einsum("bld,hdv->hblv", v, params["wv_h"], precision=hp)
    scores = jnp.einsum("hbqd,hbkd->hbqk", qh, kh, precision=hp) / temperature
    if mask.dtype == jnp.bool_:
        scores = jnp.where(mask[None], jnp.float32(-1e10), scores)   # masked_fill
    else:
        scores = scores + mask[None]
    attn = jax.nn.softmax(scores, axis=-1)
    ctx = jnp.einsum("hbqk,hbkv->hbqv", attn, vh, precision=hp)
    y = jnp.einsum("hbqv,hvd->bqd", ctx, params["fcw_h"], precision=hp)
    y = y + params["fc_b"] + q
    mu = jnp.mean(y, -1, keepdims=True)
    var = jnp.mean((y - mu) ** 2, -1, keepdims=True)
    y = (y - mu) * jax.lax.rsqrt(var + 1e-5) * params["ln_g"] + params["ln_b"]
    return y, attn.reshape(n_head * sz_b, len_q, len_k)


if __name__ == "__main__":
    n_head, d_model, d_k, d_v = 2, 32, 16, 16
    sz_b, len_q, len_k = 4, 8, 8

    key = jax.random.PRNGKey(0)
    kq, kk, kv, km, kp = jax.random.split(key, 5)

    q = jax.random.normal(kq, (sz_b, len_q, d_model), jnp.float32)
    k = jax.random.normal(kk, (sz_b, len_k, d_model), jnp.float32)
    v = jax.random.normal(kv, (sz_b, len_k, d_model), jnp.float32)
    # boolean neighbor mask (True = masked out), keep at least column 0 unmasked
    mask = jax.random.bernoulli(km, 0.3, (sz_b, len_q, len_k))
    mask = mask.at[:, :, 0].set(False)
    # additive -1e10 bias == masked_fill only when every row keeps >= 1 key
    assert bool(jnp.all(jnp.any(~mask, axis=-1)))

    params = init_params(kp, n_head, d_model, d_k, d_v)
    ref_out, ref_attn = reference_forward(
        q, k, v, mask, params, n_head=n_head, d_k=d_k, d_v=d_v)

    # 1) f32 MXU operands + exact softmax -> tight tolerance.
    out, attn = multi_head_attention_forward(
        q, k, v, mask, params, n_head=n_head, d_k=d_k, d_v=d_v,
        matmul_dtype=jnp.float32)
    out = jax.block_until_ready(out)
    attn = jax.block_until_ready(attn)
    assert out.shape == (sz_b, len_q, d_model)
    assert attn.shape == (n_head * sz_b, len_q, len_k)
    assert jnp.allclose(out, ref_out, atol=1e-3, rtol=1e-3)
    assert jnp.allclose(attn, ref_attn, atol=1e-3, rtol=1e-3)

    # 2) explicit batch tile (2 batch elements / step -> 2 grid steps).
    out_t, attn_t = multi_head_attention_forward(
        q, k, v, mask, params, n_head=n_head, d_k=d_k, d_v=d_v,
        matmul_dtype=jnp.float32, batch_tile=2)
    out_t = jax.block_until_ready(out_t)
    assert jnp.allclose(out_t, ref_out, atol=1e-3, rtol=1e-3)
    assert jnp.allclose(attn_t, ref_attn, atol=1e-3, rtol=1e-3)

    # 3) bf16 MXU operands (f32 accumulation/softmax/LayerNorm), bf16 attn output.
    out_bf, attn_bf = multi_head_attention_forward(
        q, k, v, mask, params, n_head=n_head, d_k=d_k, d_v=d_v,
        matmul_dtype=jnp.bfloat16, attn_dtype=jnp.bfloat16)
    out_bf = jax.block_until_ready(out_bf)
    attn_bf = jax.block_until_ready(attn_bf)
    assert bool(jnp.all(jnp.isfinite(out_bf)))
    assert jnp.allclose(out_bf, ref_out, atol=2e-1, rtol=1e-1)
    assert jnp.allclose(attn_bf.astype(jnp.float32), ref_attn, atol=5e-2, rtol=1e-1)

    # 4) attention probabilities skipped (largest HBM writeback removed).
    out_na, attn_na = multi_head_attention_forward(
        q, k, v, mask, params, n_head=n_head, d_k=d_k, d_v=d_v,
        matmul_dtype=jnp.bfloat16, return_attn=False)
    out_na = jax.block_until_ready(out_na)
    assert attn_na is None
    assert jnp.allclose(out_na, ref_out, atol=2e-1, rtol=1e-1)

    print("KERNEL_OK")
</pallas_src>

<mosaic_0001>
module attributes {stable_mosaic.version = 11 : i64} {
  func.func @_mha_kernel(%arg0: i32, %arg1: memref<4x8x32xf32, #tpu.memory_space<vmem>>, %arg2: memref<4x8x32xf32, #tpu.memory_space<vmem>>, %arg3: memref<4x8x32xf32, #tpu.memory_space<vmem>>, %arg4: memref<4x8x8xi8, #tpu.memory_space<vmem>>, %arg5: memref<2x32x16xf32, #tpu.memory_space<vmem>>, %arg6: memref<2x32x16xf32, #tpu.memory_space<vmem>>, %arg7: memref<2x32x16xf32, #tpu.memory_space<vmem>>, %arg8: memref<2x16x32xf32, #tpu.memory_space<vmem>>, %arg9: memref<1x32xf32, #tpu.memory_space<vmem>>, %arg10: memref<1x32xf32, #tpu.memory_space<vmem>>, %arg11: memref<1x32xf32, #tpu.memory_space<vmem>>, %arg12: memref<4x8x32xf32, #tpu.memory_space<vmem>>, %arg13: memref<2x4x8x8xf32, #tpu.memory_space<vmem>>) attributes {dimension_semantics = [#tpu.dimension_semantics<parallel>], iteration_bounds = array<i64: 1>, scalar_prefetch = 0 : i64, scratch_operands = 0 : i64, tpu.core_type = #tpu.core_type<tc>, window_params = [{transform_indices = @transform_0, window_bounds = array<i64: 4, 8, 32>}, {transform_indices = @transform_1, window_bounds = array<i64: 4, 8, 32>}, {transform_indices = @transform_2, window_bounds = array<i64: 4, 8, 32>}, {transform_indices = @transform_3, window_bounds = array<i64: 4, 8, 8>}, {pipeline_mode = #tpu.pipeline_mode<synchronous>, transform_indices = @transform_4, window_bounds = array<i64: 2, 32, 16>}, {pipeline_mode = #tpu.pipeline_mode<synchronous>, transform_indices = @transform_5, window_bounds = array<i64: 2, 32, 16>}, {pipeline_mode = #tpu.pipeline_mode<synchronous>, transform_indices = @transform_6, window_bounds = array<i64: 2, 32, 16>}, {pipeline_mode = #tpu.pipeline_mode<synchronous>, transform_indices = @transform_7, window_bounds = array<i64: 2, 16, 32>}, {pipeline_mode = #tpu.pipeline_mode<synchronous>, transform_indices = @transform_8, window_bounds = array<i64: 1, 32>}, {pipeline_mode = #tpu.pipeline_mode<synchronous>, transform_indices = @transform_9, window_bounds = array<i64: 1, 32>}, {pipeline_mode = #tpu.pipeline_mode<synchronous>, transform_indices = @transform_10, window_bounds = array<i64: 1, 32>}, {transform_indices = @transform_11, window_bounds = array<i64: 4, 8, 32>}, {transform_indices = @transform_12, window_bounds = array<i64: 2, 4, 8, 8>}]} {
    %c0 = arith.constant 0 : index
    %c0_0 = arith.constant 0 : index
    %c0_1 = arith.constant 0 : index
    %0 = vector.load %arg1[%c0, %c0_0, %c0_1] : memref<4x8x32xf32, #tpu.memory_space<vmem>>, vector<4x8x32xf32>
    %1 = vector.shape_cast %0 : vector<4x8x32xf32> to vector<32x32xf32>
    %c0_2 = arith.constant 0 : index
    %c0_3 = arith.constant 0 : index
    %c0_4 = arith.constant 0 : index
    %2 = vector.load %arg2[%c0_2, %c0_3, %c0_4] : memref<4x8x32xf32, #tpu.memory_space<vmem>>, vector<4x8x32xf32>
    %3 = vector.shape_cast %2 : vector<4x8x32xf32> to vector<32x32xf32>
    %c0_5 = arith.constant 0 : index
    %c0_6 = arith.constant 0 : index
    %c0_7 = arith.constant 0 : index
    %4 = vector.load %arg3[%c0_5, %c0_6, %c0_7] : memref<4x8x32xf32, #tpu.memory_space<vmem>>, vector<4x8x32xf32>
    %5 = vector.shape_cast %4 : vector<4x8x32xf32> to vector<32x32xf32>
    %c0_8 = arith.constant 0 : index
    %c0_9 = arith.constant 0 : index
    %c0_10 = arith.constant 0 : index
    %6 = vector.load %arg4[%c0_8, %c0_9, %c0_10] : memref<4x8x8xi8, #tpu.memory_space<vmem>>, vector<4x8x8xi8>
    %7 = arith.sitofp %6 : vector<4x8x8xi8> to vector<4x8x8xf32>
    %cst = arith.constant -1.000000e+10 : f32
    %8 = vector.broadcast %cst : f32 to vector<4x8x8xf32>
    %9 = arith.mulf %7, %8 : vector<4x8x8xf32>
    %c0_11 = arith.constant 0 : index
    %c0_12 = arith.constant 0 : index
    %10 = vector.load %arg9[%c0_11, %c0_12] : memref<1x32xf32, #tpu.memory_space<vmem>>, vector<1x32xf32>
    %11 = vector.broadcast %10 : vector<1x32xf32> to vector<32x32xf32>
    %12 = arith.addf %1, %11 : vector<32x32xf32>
    %c0_13 = arith.constant 0 : index
    %c0_14 = arith.constant 0 : index
    %c0_15 = arith.constant 0 : index
    %13 = vector.load %arg5[%c0_13, %c0_14, %c0_15] : memref<2x32x16xf32, #tpu.memory_space<vmem>>, vector<1x32x16xf32>
    %14 = vector.shape_cast %13 : vector<1x32x16xf32> to vector<32x16xf32>
    %cst_16 = arith.constant dense<0.000000e+00> : vector<32x16xf32>
    %15 = tpu.matmul %1, %14, %cst_16 {dimension_numbers = #tpu.dot_dimension_numbers<[1], [0], [0], [1], [0, 0, 1, 1], [], []>} : vector<32x32xf32>, vector<32x16xf32>, vector<32x16xf32> -> vector<32x16xf32>
    %c0_17 = arith.constant 0 : index
    %c0_18 = arith.constant 0 : index
    %c0_19 = arith.constant 0 : index
    %16 = vector.load %arg6[%c0_17, %c0_18, %c0_19] : memref<2x32x16xf32, #tpu.memory_space<vmem>>, vector<1x32x16xf32>
    %17 = vector.shape_cast %16 : vector<1x32x16xf32> to vector<32x16xf32>
    %cst_20 = arith.constant dense<0.000000e+00> : vector<32x16xf32>
    %18 = tpu.matmul %3, %17, %cst_20 {dimension_numbers = #tpu.dot_dimension_numbers<[1], [0], [0], [1], [0, 0, 1, 1], [], []>} : vector<32x32xf32>, vector<32x16xf32>, vector<32x16xf32> -> vector<32x16xf32>
    %c0_21 = arith.constant 0 : index
    %c0_22 = arith.constant 0 : index
    %c0_23 = arith.constant 0 : index
    %19 = vector.load %arg7[%c0_21, %c0_22, %c0_23] : memref<2x32x16xf32, #tpu.memory_space<vmem>>, vector<1x32x16xf32>
    %20 = vector.shape_cast %19 : vector<1x32x16xf32> to vector<32x16xf32>
    %cst_24 = arith.constant dense<0.000000e+00> : vector<32x16xf32>
    %21 = tpu.matmul %5, %20, %cst_24 {dimension_numbers = #tpu.dot_dimension_numbers<[1], [0], [0], [1], [0, 0, 1, 1], [], []>} : vector<32x32xf32>, vector<32x16xf32>, vector<32x16xf32> -> vector<32x16xf32>
    %22 = vector.shape_cast %15 : vector<32x16xf32> to vector<4x8x16xf32>
    %23 = vector.shape_cast %18 : vector<32x16xf32> to vector<4x8x16xf32>
    %24 = vector.shape_cast %21 : vector<32x16xf32> to vector<4x8x16xf32>
    "tpu.trace_start"() <{level = 10 : i32, message = "bqd,bkd->bqk"}> : () -> ()
    %cst_25 = arith.constant dense<0.000000e+00> : vector<4x8x8xf32>
    %25 = tpu.matmul %22, %23, %cst_25 {dimension_numbers = #tpu.dot_dimension_numbers<[2], [2], [1], [1], [0, 0, 0, 1, 1, 1], [0], [0]>} : vector<4x8x16xf32>, vector<4x8x16xf32>, vector<4x8x8xf32> -> vector<4x8x8xf32>
    "tpu.trace_stop"() : () -> ()
    %cst_26 = arith.constant 2.500000e-01 : f32
    %26 = vector.broadcast %cst_26 : f32 to vector<4x8x8xf32>
    %27 = arith.mulf %25, %26 : vector<4x8x8xf32>
    %28 = arith.addf %27, %9 : vector<4x8x8xf32>
    %cst_27 = arith.constant dense<0xFF800000> : vector<4x8xf32>
    %29 = vector.multi_reduction <maximumf>, %28, %cst_27 [2] : vector<4x8x8xf32> to vector<4x8xf32>
    %30 = vector.shape_cast %29 : vector<4x8xf32> to vector<4x8x1xf32>
    %31 = vector.broadcast %30 : vector<4x8x1xf32> to vector<4x8x8xf32>
    %32 = arith.subf %28, %31 : vector<4x8x8xf32>
    %33 = math.exp %32 : vector<4x8x8xf32>
    %cst_28 = arith.constant dense<0.000000e+00> : vector<4x8xf32>
    %34 = vector.multi_reduction <add>, %33, %cst_28 [2] : vector<4x8x8xf32> to vector<4x8xf32>
    %35 = vector.shape_cast %34 : vector<4x8xf32> to vector<4x8x1xf32>
    %36 = vector.broadcast %35 : vector<4x8x1xf32> to vector<4x8x8xf32>
    %37 = arith.divf %33, %36 : vector<4x8x8xf32>
    %c0_29 = arith.constant 0 : index
    %c0_30 = arith.constant 0 : index
    %c0_31 = arith.constant 0 : index
    %c0_32 = arith.constant 0 : index
    %38 = vector.load %arg13[%c0_29, %c0_30, %c0_31, %c0_32] : memref<2x4x8x8xf32, #tpu.memory_space<vmem>>, vector<1x4x8x8xf32>
    %39 = vector.shape_cast %38 : vector<1x4x8x8xf32> to vector<4x8x8xf32>
    %40 = vector.shape_cast %37 : vector<4x8x8xf32> to vector<1x4x8x8xf32>
    tpu.vector_store %arg13[%c0_29, %c0_30, %c0_31, %c0_32], %40 {strides = array<i32>} : memref<2x4x8x8xf32, #tpu.memory_space<vmem>>, vector<1x4x8x8xf32>,
    "tpu.trace_start"() <{level = 10 : i32, message = "bqk,bkv->bqv"}> : () -> ()
    %cst_33 = arith.constant dense<0.000000e+00> : vector<4x8x16xf32>
    %41 = tpu.matmul %37, %24, %cst_33 {dimension_numbers = #tpu.dot_dimension_numbers<[2], [1], [1], [2], [0, 0, 0, 1, 1, 2], [0], [0]>} : vector<4x8x8xf32>, vector<4x8x16xf32>, vector<4x8x16xf32> -> vector<4x8x16xf32>
    "tpu.trace_stop"() : () -> ()
    %42 = vector.shape_cast %41 : vector<4x8x16xf32> to vector<32x16xf32>
    %c0_34 = arith.constant 0 : index
    %c0_35 = arith.constant 0 : index
    %c0_36 = arith.constant 0 : index
    %43 = vector.load %arg8[%c0_34, %c0_35, %c0_36] : memref<2x16x32xf32, #tpu.memory_space<vmem>>, vector<1x16x32xf32>
    %44 = vector.shape_cast %43 : vector<1x16x32xf32> to vector<16x32xf32>
    %cst_37 = arith.constant dense<0.000000e+00> : vector<32x32xf32>
    %45 = tpu.matmul %42, %44, %cst_37 {dimension_numbers = #tpu.dot_dimension_numbers<[1], [0], [0], [1], [0, 0, 1, 1], [], []>} : vector<32x16xf32>, vector<16x32xf32>, vector<32x32xf32> -> vector<32x32xf32>
    %46 = arith.addf %12, %45 : vector<32x32xf32>
    %c1 = arith.constant 1 : index
    %c0_38 = arith.constant 0 : index
    %c0_39 = arith.constant 0 : index
    %47 = vector.load %arg5[%c1, %c0_38, %c0_39] : memref<2x32x16xf32, #tpu.memory_space<vmem>>, vector<1x32x16xf32>
    %48 = vector.shape_cast %47 : vector<1x32x16xf32> to vector<32x16xf32>
    %cst_40 = arith.constant dense<0.000000e+00> : vector<32x16xf32>
    %49 = tpu.matmul %1, %48, %cst_40 {dimension_numbers = #tpu.dot_dimension_numbers<[1], [0], [0], [1], [0, 0, 1, 1], [], []>} : vector<32x32xf32>, vector<32x16xf32>, vector<32x16xf32> -> vector<32x16xf32>
    %c1_41 = arith.constant 1 : index
    %c0_42 = arith.constant 0 : index
    %c0_43 = arith.constant 0 : index
    %50 = vector.load %arg6[%c1_41, %c0_42, %c0_43] : memref<2x32x16xf32, #tpu.memory_space<vmem>>, vector<1x32x16xf32>
    %51 = vector.shape_cast %50 : vector<1x32x16xf32> to vector<32x16xf32>
    %cst_44 = arith.constant dense<0.000000e+00> : vector<32x16xf32>
    %52 = tpu.matmul %3, %51, %cst_44 {dimension_numbers = #tpu.dot_dimension_numbers<[1], [0], [0], [1], [0, 0, 1, 1], [], []>} : vector<32x32xf32>, vector<32x16xf32>, vector<32x16xf32> -> vector<32x16xf32>
    %c1_45 = arith.constant 1 : index
    %c0_46 = arith.constant 0 : index
    %c0_47 = arith.constant 0 : index
    %53 = vector.load %arg7[%c1_45, %c0_46, %c0_47] : memref<2x32x16xf32, #tpu.memory_space<vmem>>, vector<1x32x16xf32>
    %54 = vector.shape_cast %53 : vector<1x32x16xf32> to vector<32x16xf32>
    %cst_48 = arith.constant dense<0.000000e+00> : vector<32x16xf32>
    %55 = tpu.matmul %5, %54, %cst_48 {dimension_numbers = #tpu.dot_dimension_numbers<[1], [0], [0], [1], [0, 0, 1, 1], [], []>} : vector<32x32xf32>, vector<32x16xf32>, vector<32x16xf32> -> vector<32x16xf32>
    %56 = vector.shape_cast %49 : vector<32x16xf32> to vector<4x8x16xf32>
    %57 = vector.shape_cast %52 : vector<32x16xf32> to vector<4x8x16xf32>
    %58 = vector.shape_cast %55 : vector<32x16xf32> to vector<4x8x16xf32>
    "tpu.trace_start"() <{level = 10 : i32, message = "bqd,bkd->bqk"}> : () -> ()
    %cst_49 = arith.constant dense<0.000000e+00> : vector<4x8x8xf32>
    %59 = tpu.matmul %56, %57, %cst_49 {dimension_numbers = #tpu.dot_dimension_numbers<[2], [2], [1], [1], [0, 0, 0, 1, 1, 1], [0], [0]>} : vector<4x8x16xf32>, vector<4x8x16xf32>, vector<4x8x8xf32> -> vector<4x8x8xf32>
    "tpu.trace_stop"() : () -> ()
    %cst_50 = arith.constant 2.500000e-01 : f32
    %60 = vector.broadcast %cst_50 : f32 to vector<4x8x8xf32>
    %61 = arith.mulf %59, %60 : vector<4x8x8xf32>
    %62 = arith.addf %61, %9 : vector<4x8x8xf32>
    %cst_51 = arith.constant dense<0xFF800000> : vector<4x8xf32>
    %63 = vector.multi_reduction <maximumf>, %62, %cst_51 [2] : vector<4x8x8xf32> to vector<4x8xf32>
    %64 = vector.shape_cast %63 : vector<4x8xf32> to vector<4x8x1xf32>
    %65 = vector.broadcast %64 : vector<4x8x1xf32> to vector<4x8x8xf32>
    %66 = arith.subf %62, %65 : vector<4x8x8xf32>
    %67 = math.exp %66 : vector<4x8x8xf32>
    %cst_52 = arith.constant dense<0.000000e+00> : vector<4x8xf32>
    %68 = vector.multi_reduction <add>, %67, %cst_52 [2] : vector<4x8x8xf32> to vector<4x8xf32>
    %69 = vector.shape_cast %68 : vector<4x8xf32> to vector<4x8x1xf32>
    %70 = vector.broadcast %69 : vector<4x8x1xf32> to vector<4x8x8xf32>
    %71 = arith.divf %67, %70 : vector<4x8x8xf32>
    %c1_53 = arith.constant 1 : index
    %c0_54 = arith.constant 0 : index
    %c0_55 = arith.constant 0 : index
    %c0_56 = arith.constant 0 : index
    %72 = vector.load %arg13[%c1_53, %c0_54, %c0_55, %c0_56] : memref<2x4x8x8xf32, #tpu.memory_space<vmem>>, vector<1x4x8x8xf32>
    %73 = vector.shape_cast %72 : vector<1x4x8x8xf32> to vector<4x8x8xf32>
    %74 = vector.shape_cast %71 : vector<4x8x8xf32> to vector<1x4x8x8xf32>
    tpu.vector_store %arg13[%c1_53, %c0_54, %c0_55, %c0_56], %74 {strides = array<i32>} : memref<2x4x8x8xf32, #tpu.memory_space<vmem>>, vector<1x4x8x8xf32>,
    "tpu.trace_start"() <{level = 10 : i32, message = "bqk,bkv->bqv"}> : () -> ()
    %cst_57 = arith.constant dense<0.000000e+00> : vector<4x8x16xf32>
    %75 = tpu.matmul %71, %58, %cst_57 {dimension_numbers = #tpu.dot_dimension_numbers<[2], [1], [1], [2], [0, 0, 0, 1, 1, 2], [0], [0]>} : vector<4x8x8xf32>, vector<4x8x16xf32>, vector<4x8x16xf32> -> vector<4x8x16xf32>
    "tpu.trace_stop"() : () -> ()
    %76 = vector.shape_cast %75 : vector<4x8x16xf32> to vector<32x16xf32>
    %c1_58 = arith.constant 1 : index
    %c0_59 = arith.constant 0 : index
    %c0_60 = arith.constant 0 : index
    %77 = vector.load %arg8[%c1_58, %c0_59, %c0_60] : memref<2x16x32xf32, #tpu.memory_space<vmem>>, vector<1x16x32xf32>
    %78 = vector.shape_cast %77 : vector<1x16x32xf32> to vector<16x32xf32>
    %cst_61 = arith.constant dense<0.000000e+00> : vector<32x32xf32>
    %79 = tpu.matmul %76, %78, %cst_61 {dimension_numbers = #tpu.dot_dimension_numbers<[1], [0], [0], [1], [0, 0, 1, 1], [], []>} : vector<32x16xf32>, vector<16x32xf32>, vector<32x32xf32> -> vector<32x32xf32>
    %80 = arith.addf %46, %79 : vector<32x32xf32>
    %cst_62 = arith.constant dense<0.000000e+00> : vector<32xf32>
    %81 = vector.multi_reduction <add>, %80, %cst_62 [1] : vector<32x32xf32> to vector<32xf32>
    %82 = vector.shape_cast %81 : vector<32xf32> to vector<32x1xf32>
    %cst_63 = arith.constant 3.200000e+01 : f32
    %83 = vector.broadcast %cst_63 : f32 to vector<32x1xf32>
    %84 = arith.divf %82, %83 : vector<32x1xf32>
    %85 = vector.broadcast %84 : vector<32x1xf32> to vector<32x32xf32>
    %86 = arith.subf %80, %85 : vector<32x32xf32>
    %87 = vector.broadcast %84 : vector<32x1xf32> to vector<32x32xf32>
    %88 = arith.subf %80, %87 : vector<32x32xf32>
    %89 = arith.mulf %86, %88 : vector<32x32xf32>
    %cst_64 = arith.constant dense<0.000000e+00> : vector<32xf32>
    %90 = vector.multi_reduction <add>, %89, %cst_64 [1] : vector<32x32xf32> to vector<32xf32>
    %91 = vector.shape_cast %90 : vector<32xf32> to vector<32x1xf32>
    %cst_65 = arith.constant 3.200000e+01 : f32
    %92 = vector.broadcast %cst_65 : f32 to vector<32x1xf32>
    %93 = arith.divf %91, %92 : vector<32x1xf32>
    %94 = vector.broadcast %84 : vector<32x1xf32> to vector<32x32xf32>
    %95 = arith.subf %80, %94 : vector<32x32xf32>
    %cst_66 = arith.constant 9.99999974E-6 : f32
    %96 = vector.broadcast %cst_66 : f32 to vector<32x1xf32>
    %97 = arith.addf %93, %96 : vector<32x1xf32>
    %98 = math.rsqrt %97 : vector<32x1xf32>
    %99 = vector.broadcast %98 : vector<32x1xf32> to vector<32x32xf32>
    %100 = arith.mulf %95, %99 : vector<32x32xf32>
    %c0_67 = arith.constant 0 : index
    %c0_68 = arith.constant 0 : index
    %101 = vector.load %arg10[%c0_67, %c0_68] : memref<1x32xf32, #tpu.memory_space<vmem>>, vector<1x32xf32>
    %102 = vector.broadcast %101 : vector<1x32xf32> to vector<32x32xf32>
    %103 = arith.mulf %100, %102 : vector<32x32xf32>
    %c0_69 = arith.constant 0 : index
    %c0_70 = arith.constant 0 : index
    %104 = vector.load %arg11[%c0_69, %c0_70] : memref<1x32xf32, #tpu.memory_space<vmem>>, vector<1x32xf32>
    %105 = vector.broadcast %104 : vector<1x32xf32> to vector<32x32xf32>
    %106 = arith.addf %103, %105 : vector<32x32xf32>
    %107 = vector.shape_cast %106 : vector<32x32xf32> to vector<4x8x32xf32>
    %c0_71 = arith.constant 0 : index
    %c0_72 = arith.constant 0 : index
    %c0_73 = arith.constant 0 : index
    %108 = vector.load %arg12[%c0_71, %c0_72, %c0_73] : memref<4x8x32xf32, #tpu.memory_space<vmem>>, vector<4x8x32xf32>
    tpu.vector_store %arg12[%c0_71, %c0_72, %c0_73], %107 {strides = array<i32>} : memref<4x8x32xf32, #tpu.memory_space<vmem>>, vector<4x8x32xf32>,
    return
  }
  func.func @transform_0(%arg0: i32) -> (i32, i32, i32) {
    %c0_i32 = arith.constant 0 : i32
    %c0_i32_0 = arith.constant 0 : i32
    %c0_i32_1 = arith.constant 0 : i32
    return %arg0, %c0_i32, %c0_i32_0 : i32, i32, i32
  }
  func.func @transform_1(%arg0: i32) -> (i32, i32, i32) {
    %c0_i32 = arith.constant 0 : i32
    %c0_i32_0 = arith.constant 0 : i32
    %c0_i32_1 = arith.constant 0 : i32
    return %arg0, %c0_i32, %c0_i32_0 : i32, i32, i32
  }
  func.func @transform_2(%arg0: i32) -> (i32, i32, i32) {
    %c0_i32 = arith.constant 0 : i32
    %c0_i32_0 = arith.constant 0 : i32
    %c0_i32_1 = arith.constant 0 : i32
    return %arg0, %c0_i32, %c0_i32_0 : i32, i32, i32
  }
  func.func @transform_3(%arg0: i32) -> (i32, i32, i32) {
    %c0_i32 = arith.constant 0 : i32
    %c0_i32_0 = arith.constant 0 : i32
    %c0_i32_1 = arith.constant 0 : i32
    return %arg0, %c0_i32, %c0_i32_0 : i32, i32, i32
  }
  func.func @transform_4(%arg0: i32) -> (i32, i32, i32) {
    %c0_i32 = arith.constant 0 : i32
    %c0_i32_0 = arith.constant 0 : i32
    %c0_i32_1 = arith.constant 0 : i32
    %c0_i32_2 = arith.constant 0 : i32
    return %c0_i32, %c0_i32_0, %c0_i32_1 : i32, i32, i32
  }
  func.func @transform_5(%arg0: i32) -> (i32, i32, i32) {
    %c0_i32 = arith.constant 0 : i32
    %c0_i32_0 = arith.constant 0 : i32
    %c0_i32_1 = arith.constant 0 : i32
    %c0_i32_2 = arith.constant 0 : i32
    return %c0_i32, %c0_i32_0, %c0_i32_1 : i32, i32, i32
  }
  func.func @transform_6(%arg0: i32) -> (i32, i32, i32) {
    %c0_i32 = arith.constant 0 : i32
    %c0_i32_0 = arith.constant 0 : i32
    %c0_i32_1 = arith.constant 0 : i32
    %c0_i32_2 = arith.constant 0 : i32
    return %c0_i32, %c0_i32_0, %c0_i32_1 : i32, i32, i32
  }
  func.func @transform_7(%arg0: i32) -> (i32, i32, i32) {
    %c0_i32 = arith.constant 0 : i32
    %c0_i32_0 = arith.constant 0 : i32
    %c0_i32_1 = arith.constant 0 : i32
    %c0_i32_2 = arith.constant 0 : i32
    return %c0_i32, %c0_i32_0, %c0_i32_1 : i32, i32, i32
  }
  func.func @transform_8(%arg0: i32) -> (i32, i32) {
    %c0_i32 = arith.constant 0 : i32
    %c0_i32_0 = arith.constant 0 : i32
    %c0_i32_1 = arith.constant 0 : i32
    return %c0_i32, %c0_i32_0 : i32, i32
  }
  func.func @transform_9(%arg0: i32) -> (i32, i32) {
    %c0_i32 = arith.constant 0 : i32
    %c0_i32_0 = arith.constant 0 : i32
    %c0_i32_1 = arith.constant 0 : i32
    return %c0_i32, %c0_i32_0 : i32, i32
  }
  func.func @transform_10(%arg0: i32) -> (i32, i32) {
    %c0_i32 = arith.constant 0 : i32
    %c0_i32_0 = arith.constant 0 : i32
    %c0_i32_1 = arith.constant 0 : i32
    return %c0_i32, %c0_i32_0 : i32, i32
  }
  func.func @transform_11(%arg0: i32) -> (i32, i32, i32) {
    %c0_i32 = arith.constant 0 : i32
    %c0_i32_0 = arith.constant 0 : i32
    %c0_i32_1 = arith.constant 0 : i32
    return %arg0, %c0_i32, %c0_i32_0 : i32, i32, i32
  }
  func.func @transform_12(%arg0: i32) -> (i32, i32, i32, i32) {
    %c0_i32 = arith.constant 0 : i32
    %c0_i32_0 = arith.constant 0 : i32
    %c0_i32_1 = arith.constant 0 : i32
    %c0_i32_2 = arith.constant 0 : i32
    return %c0_i32, %arg0, %c0_i32_0, %c0_i32_1 : i32, i32, i32, i32
  }
}

</mosaic_0001>

<bundles_post_ra>
// kernel: tpu_custom_call.1
= control target key start
LH: loop header
LB: loop body
LE: loop exit
PB: predicated region body
PF: predicated region fallthrough
CT: control target
= control target key end

     0   :  { %18 = vsyncpa [#allocation3], 0  ;;  %vm85_vm0 = vcmask 261120   ;;  %s3249_s0 = inlined_call_operand.vmem [shape: f32[4,8,32], index: 0, kind: input, shape index: {}]   ;;  %s3250_s1 = inlined_call_operand.vmem [shape: f32[4,8,32], index: 1, kind: input, shape index: {}]   ;;  %s3251_s2 = inlined_call_operand.vmem [shape: f32[4,8,32], index: 2, kind: input, shape index: {}]   ;;  %s3252_s3 = inlined_call_operand.vmem [shape: s8[4,8,8], index: 3, kind: input, shape index: {}]   ;;  %s3253_s4 = inlined_call_operand.vmem [shape: f32[2,32,16], index: 4, kind: input, shape index: {}]   ;;  %s3254_s5 = inlined_call_operand.vmem [shape: f32[2,32,16], index: 5, kind: input, shape index: {}]   ;;  %s3255_s6 = inlined_call_operand.vmem [shape: f32[2,32,16], index: 6, kind: input, shape index: {}]   ;;  %s3256_s7 = inlined_call_operand.vmem [shape: f32[2,16,32], index: 7, kind: input, shape index: {}]   ;;  %s3257_s8 = inlined_call_operand.vmem [shape: f32[1,32], index: 8, kind: input, shape index: {}]   ;;  %s3258_s9 = inlined_call_operand.vmem [shape: f32[1,32], index: 9, kind: input, shape index: {}]   ;;  %s3259_s10 = inlined_call_operand.vmem [shape: f32[1,32], index: 10, kind: input, shape index: {}]   ;;  %s3260_s11 = inlined_call_operand.hbm [shape: f32[4,8,32], index: 11, kind: output, shape index: {0}]   ;;  %s3261_s12 = inlined_call_operand.hbm [shape: f32[2,4,8,8], index: 12, kind: output, shape index: {1}]  }
   0x1   :  { %v81_v0 = vld [vmem:[%s3253_s4] sm:$0xff]  ;;  %v82_v1 = vld [vmem:[%s3253_s4 + $0x8] sm:$0xff]  ;;  %v83_v2 = vld [vmem:[%s3253_s4 + $0x10] sm:$0xff] }
   0x2   :  { %v2637_v3 = vpack.c.bf16 %v82_v1, %v81_v0  ;;  %v84_v4 = vld [vmem:[%s3253_s4 + $0x18] sm:$0xff]  ;;  %v2882_v5 = vld [vmem:[%s3249_s0] sm:$0xff]  ;;  %v184_v8 = vld [vmem:[%s3254_s5 + $0x8] sm:$0xff] }
   0x3   :  { %v2641_v6 = vpack.c.bf16 %v84_v4, %v83_v2  ;;  %2461 = vmatprep.mubr.msk.f32.mxu1 %vm85_vm0, %v2882_v5  ;;  %v183_v7 = vld [vmem:[%s3254_s5] sm:$0xff] }
   0x4   :  { %2638 = vmatprep.subr.bf16.mxu1 %v2637_v3  ;;  %v2645_v9 = vpack.c.bf16 %v184_v8, %v183_v7 }
   0x5   :  { %2640 = vmatpush3.bf16.msra.mxu1 %v2637_v3 }
   0x6   :  { %2642 = vmatprep.subr.bf16.mxu1 %v2641_v6 }
   0x7   :  { %19 = vsyncpa [#allocation5], 0  ;;  %v185_v10 = vld [vmem:[%s3254_s5 + $0x10] sm:$0xff]  ;;  %v186_v11 = vld [vmem:[%s3254_s5 + $0x18] sm:$0xff]  ;;  %v2796_v28 = vmov 0.0   ;;  %vm2797_vm1 = vmmov 0  }
   0x8   :  { %v2901_v12 = vld [vmem:[%s3249_s0 + $0x8] sm:$0xff]  ;;  %v2906_v13 = vld [vmem:[%s3249_s0 + $0x10] sm:$0xff]  ;;  %v2649_v14 = vpack.c.bf16 %v186_v11, %v185_v10  ;;  %v2915_v15 = vld [vmem:[%s3249_s0 + $0x18] sm:$0xff]  ;;  %vm385_vm2 = vcmask 130048   ;;  %vm698_vm3 = vcmask 64512  }
   0x9   :  { %2644 = vmatpush3.bf16.msra.mxu1 %v2641_v6  ;;  %v2920_v16 = vld [vmem:[%s3250_s1] sm:$0xff]  ;;  %v2929_v17 = vld [vmem:[%s3250_s1 + $0x8] sm:$0xff]  ;;  %v2934_v18 = vld [vmem:[%s3250_s1 + $0x10] sm:$0xff] }
   0xa   :  { %2646 = vmatprep.subr.bf16.mxu1 %v2645_v9  ;;  %v2943_v19 = vld [vmem:[%s3250_s1 + $0x18] sm:$0xff]  ;;  %v284_v20 = vld [vmem:[%s3255_s6] sm:$0xff]  ;;  %v285_v21 = vld [vmem:[%s3255_s6 + $0x8] sm:$0xff] }
   0xb   :  { %v2653_v22 = vpack.c.bf16 %v285_v21, %v284_v20  ;;  %v286_v23 = vld [vmem:[%s3255_s6 + $0x10] sm:$0xff]  ;;  %v287_v24 = vld [vmem:[%s3255_s6 + $0x18] sm:$0xff]  ;;  %v2962_v26 = vld [vmem:[%s3251_s2] sm:$0xff] }
   0xc   :  { %2462 = vmatmul.mubr.msk.f32.vlgmr.msra.gmra.mrb[0].mxu1 %vm85_vm0, %v2901_v12  ;;  %v2657_v25 = vpack.c.bf16 %v287_v24, %v286_v23  ;;  %2489 = vmatprep.mubr.msk.f32.mxu0 %vm85_vm0, %v2962_v26  ;;  %v2969_v27 = vld [vmem:[%s3251_s2 + $0x8] sm:$0xff]  ;;  %v2978_v29 = vld [vmem:[%s3251_s2 + $0x10] sm:$0xff]  ;;  %v2985_v30 = vld [vmem:[%s3251_s2 + $0x18] sm:$0xff] }
   0xd   :  { %2648 = vmatpush3.bf16.msra.mxu1 %v2645_v9  ;;  %2464 = vmatprep.mubr.msk.f32.mxu1 %vm85_vm0, %v2906_v13  ;;  %v2354_v43 = vld [vmem:[%s3252_s3] sm:$0xff]  }
   0xe   :  { %2650 = vmatprep.subr.bf16.mxu1 %v2649_v14  ;;  %2654 = vmatprep.subr.bf16.mxu0 %v2653_v22  ;;  %v2355_v44 = vunpack.c.0.s8 %v2354_v43  ;;  %v2359_v46 = vunpack.c.2.s8 %v2354_v43  ;;  %v2356_v47 = vunpack.c.1.s8 %v2354_v43  ;;  %v2360_v51 = vunpack.c.3.s8 %v2354_v43 }
   0xf   :  { %2656 = vmatpush3.bf16.msra.mxu0 %v2653_v22 }
  0x10   :  { %2465 = vmatmul.mubr.msk.f32.gmra.mrb[2].mxu1 %vm85_vm0, %v2915_v15  ;;  %2658 = vmatprep.subr.bf16.mxu0 %v2657_v25  ;;  %v62_v45 = vcvt.s32.f32 %v2355_v44  ;;  %v64_v49 = vcvt.s32.f32 %v2359_v46  ;;  %v63_v50 = vcvt.s32.f32 %v2356_v47  ;;  %v65_v58 = vcvt.s32.f32 %v2360_v51 }
  0x11   :  { %2652 = vmatpush3.bf16.msra.mxu1 %v2649_v14  ;;  %2475 = vmatprep.mubr.msk.f32.mxu1 %vm85_vm0, %v2920_v16 }
  0x12   :  { %2495 = vmatprep.subr.mxu1 %v2796_v28  ;;  %v3022_v48 = vmul.f32 -1e+10, %v62_v45  ;;  %v3025_v56 = vmul.f32 -1e+10, %v64_v49  ;;  %v3027_v57 = vmul.f32 -1e+10, %v63_v50 }
  0x13   :  { %2660 = vmatpush3.bf16.msra.mxu0 %v2657_v25  ;;  %v3032_v4 = vmul.f32 -1e+10, %v65_v58 }
  0x14   :  { %2476 = vmatmul.mubr.msk.f32.vlgmr.msra.gmra.mrb[4].mxu1 %vm85_vm0, %v2929_v17  ;;  %2505 = vmatprep.subr.mxu0 %v2796_v28 }
  0x15   :  { %2478 = vmatprep.mubr.msk.f32.mxu1 %vm85_vm0, %v2934_v18 }
  0x16   :  { %2490 = vmatmul.mubr.msk.f32.vlgmr.msra.gmra.mrb[0].mxu0 %vm85_vm0, %v2969_v27 }
  0x17   :  { %2492 = vmatprep.mubr.msk.f32.mxu0 %vm85_vm0, %v2978_v29 }
  0x18   :  { %2479 = vmatmul.mubr.msk.f32.gmra.mrb[6].mxu1 %vm85_vm0, %v2943_v19 }
  0x19   :  { %2497 = vmatprep.mubr.msk.f32.mxu1 %vm2797_vm1, %v2796_v28 }
  0x1a   :  { %2493 = vmatmul.mubr.msk.f32.gmra.mrb[2].mxu0 %vm85_vm0, %v2985_v30 }
  0x1b   :  { %2507 = vmatprep.mubr.msk.f32.mxu0 %vm2797_vm1, %v2796_v28 }
  0xdf   :  { %v2463_v31 = vpop.f32.mrb[0].mxu1 }
  0xe0   :  { %v164_v32 = vpop.f32.mrb[1].mxu1 }
  0xe3   :  { %v2466_v33 = vpop.f32.mrb[2].mxu1 }
  0xe4   :  { %v174_v34 = vpop.f32.mrb[3].mxu1 }
  0xe7   :  { %v2477_v35 = vpop.f32.mrb[4].mxu1 }
  0xe8   :  { %v265_v36 = vpop.f32.mrb[5].mxu1 }
  0xe9   :  { %2496 = vmatpush3.xpose.msk.msra.mxu1 %vm385_vm2, %v265_v36  ;;  %v2491_v39 = vpop.f32.mrb[0].mxu0 }
  0xea   :  { %2500 = vmatprep.subr.mxu1 %v2796_v28  ;;  %v366_v40 = vpop.f32.mrb[1].mxu0 }
  0xeb   :  { %v2480_v37 = vpop.f32.mrb[6].mxu1 }
  0xec   :  { %v275_v38 = vpop.f32.mrb[7].mxu1  ;;  %2498 = vmatmul.mubr.msk.f32.vlgmr.msra.gmra.mrb[8].mxu1 %vm385_vm2, %v164_v32 }
  0xed   :  { %2501 = vmatpush3.xpose.msk.msra.mxu1 %vm385_vm2, %v2477_v35  ;;  %2506 = vmatpush3.xpose.msk.msra.mxu0 %vm385_vm2, %v275_v38  ;;  %v3015_v41 = vpop.f32.mrb[2].mxu0 }
  0xee   :  { %2502 = vmatprep.mubr.msk.f32.mxu1 %vm2797_vm1, %v2796_v28  ;;  %2510 = vmatprep.subr.mxu1 %v2796_v28  ;;  %v3017_v42 = vpop.f32.mrb[3].mxu0 }
  0xef   :  { %2515 = vmatprep.subr.mxu0 %v2796_v28 }
  0xf0   :  { %2503 = vmatmul.mubr.msk.f32.vlgmr.msra.gmra.mrb[10].mxu1 %vm385_vm2, %v2463_v31  ;;  %2508 = vmatmul.mubr.msk.f32.vlgmr.msra.gmra.mrb[4].mxu0 %vm385_vm2, %v174_v34 }
  0xf1   :  { %2511 = vmatpush3.xpose.msk.msra.mxu1 %vm385_vm2, %v2480_v37  ;;  %2512 = vmatprep.mubr.msk.f32.mxu1 %vm2797_vm1, %v2796_v28 }
  0xf2   :  { %2520 = vmatprep.subr.mxu1 %v2796_v28  ;;  %2517 = vmatprep.mubr.msk.f32.mxu0 %vm2797_vm1, %v2796_v28 }
  0xf3   :  { %2516 = vmatpush3.msra.mxu0 %v366_v40 }
  0xf4   :  { %2513 = vmatmul.mubr.msk.f32.vlgmr.msra.gmra.mrb[12].mxu1 %vm385_vm2, %v2466_v33  ;;  %2525 = vmatprep.subr.mxu0 %v2796_v28 }
  0xf5   :  { %2522 = vmatprep.mubr.msk.f32.mxu1 %vm2797_vm1, %v2796_v28  ;;  %2521 = vmatpush3.msra.mxu1 %v2491_v39 }
  0xf6   :  { %2530 = vmatprep.subr.mxu1 %v2796_v28 }
 0x1bf   :  { %v458_v52 = vpop.f32.mrb[8].mxu1 }
 0x1c0   :  { %v690_v53 = vmul.f32 0.25, %v458_v52  ;;  %v2499_v54 = vpop.f32.mrb[9].mxu1 }
 0x1c2   :  { %v694_v55 = vadd.f32 %v690_v53, %v3022_v48 }
 0x1c3   :  { %v534_v59 = vpop.f32.mrb[10].mxu1  ;;  %v610_v60 = vpop.f32.mrb[4].mxu0 }
 0x1c4   :  { %v691_v61 = vmul.f32 0.25, %v534_v59  ;;  %v692_v62 = vmul.f32 0.25, %v610_v60  ;;  %v2504_v63 = vpop.f32.mrb[11].mxu1  ;;  %v2509_v0 = vpop.f32.mrb[5].mxu0  ;;  %v699_v1 = vsel %vm698_vm3, %v694_v55, -inf }
 0x1c5   :  { %700 = vmax.xlane.f32.xlu0 %v699_v1  ;;  %v2317_v63 = vld [vmem:[%s3254_s5 + $0x20] sm:$0xff]  ;;  %v2318_v0 = vld [vmem:[%s3254_s5 + $0x28] sm:$0xff] }
 0x1c6   :  { %v696_v2 = vadd.f32 %v692_v62, %v3025_v56  ;;  %v695_v3 = vadd.f32 %v691_v61, %v3027_v57  ;;  %v1039_v61 = vld [vmem:[%s3256_s7] sm:$0xff]  ;;  %v1040_v62 = vld [vmem:[%s3256_s7 + $0x8] sm:$0xff]  ;;  %v2673_v1 = vpack.c.bf16 %v2318_v0, %v2317_v63 }
 0x1c7   :  { %v686_v6 = vpop.f32.mrb[12].mxu1 }
 0x1c8   :  { %v693_v7 = vmul.f32 0.25, %v686_v6  ;;  %v2514_v8 = vpop.f32.mrb[13].mxu1  ;;  %v705_v9 = vsel %vm698_vm3, %v696_v2, -inf  ;;  %v702_v10 = vsel %vm698_vm3, %v695_v3, -inf }
 0x1c9   :  { %706 = vmax.xlane.f32.xlu1 %v705_v9  ;;  %703 = vmax.xlane.f32.xlu0 %v702_v10  ;;  %v2312_v8 = vld [vmem:[%s3253_s4 + $0x38] sm:$0xff]  ;;  %v2325_v10 = vld [vmem:[%s3255_s6 + $0x20] sm:$0xff] }
 0x1ca   :  { %v697_v11 = vadd.f32 %v693_v7, %v3032_v4  ;;  %v2311_v7 = vld [vmem:[%s3253_s4 + $0x30] sm:$0xff] }
 0x1cb   :  { %v2669_v9 = vpack.c.bf16 %v2312_v8, %v2311_v7 }
 0x1cc   :  { %v708_v14 = vsel %vm698_vm3, %v697_v11, -inf }
 0x1cd   :  { %709 = vmax.xlane.f32.xlu1 %v708_v14  ;;  %v2327_v14 = vld [vmem:[%s3255_s6 + $0x30] sm:$0xff] }
 0x252   :  { %v701_v20 = vpop.xlane.xlu0 %700 }
 0x253   :  { %v711_v21 = vsub.f32 %v694_v55, %v701_v20 }
 0x255   :  { %v715_v22 = vmul.f32 1.442695, %v711_v21  ;;  %v2328_v21 = vld [vmem:[%s3255_s6 + $0x38] sm:$0xff] }
 0x256   :  { %v707_v23 = vpop.xlane.xlu1 %706  ;;  %v704_v24 = vpop.xlane.xlu0 %703 }
 0x257   :  { %2708 = vpow2.f32 %v715_v22  ;;  %v713_v25 = vsub.f32 %v696_v2, %v707_v23  ;;  %v712_v31 = vsub.f32 %v695_v3, %v704_v24  ;;  %v2309_v2 = vld [vmem:[%s3253_s4 + $0x20] sm:$0xff]  ;;  %v2310_v3 = vld [vmem:[%s3253_s4 + $0x28] sm:$0xff]  ;;  %v2685_v22 = vpack.c.bf16 %v2328_v21, %v2327_v14 }
 0x258   :  { %v2665_v6 = vpack.c.bf16 %v2310_v3, %v2309_v2 }
 0x259   :  { %v719_v32 = vmul.f32 1.442695, %v713_v25  ;;  %v717_v33 = vmul.f32 1.442695, %v712_v31 }
 0x25a   :  { %v710_v34 = vpop.xlane.xlu1 %709 }
 0x25b   :  { %2710 = vpow2.f32 %v719_v32  ;;  %v714_v35 = vsub.f32 %v697_v11, %v710_v34  ;;  %v2326_v11 = vld [vmem:[%s3255_s6 + $0x28] sm:$0xff] }
 0x25c   :  { %2712 = vpow2.f32 %v717_v33  ;;  %v2681_v20 = vpack.c.bf16 %v2326_v11, %v2325_v10 }
 0x25d   :  { %v721_v36 = vmul.f32 1.442695, %v714_v35 }
 0x25f   :  { %2714 = vpow2.f32 %v721_v36 }
 0x261   :  { %v2709_v37 = vpop.eup %2708 }
 0x262   :  { %v723_v38 = vsel %vm698_vm3, %v2709_v37, 0.0 }
 0x263   :  { %724 = vadd.xlane.f32.xlu0 %v723_v38 }
 0x265   :  { %v2711_v39 = vpop.eup %2710 }
 0x266   :  { %v2713_v40 = vpop.eup %2712  ;;  %v729_v43 = vsel %vm698_vm3, %v2711_v39, 0.0 }
 0x267   :  { %730 = vadd.xlane.f32.xlu0 %v729_v43  ;;  %v726_v44 = vsel %vm698_vm3, %v2713_v40, 0.0 }
 0x268   :  { %727 = vadd.xlane.f32.xlu1 %v726_v44 }
 0x269   :  { %v2715_v45 = vpop.eup %2714 }
 0x26a   :  { %v732_v46 = vsel %vm698_vm3, %v2715_v45, 0.0 }
 0x26c   :  { %733 = vadd.xlane.f32.xlu1 %v732_v46 }
 0x2f0   :  { %v725_v47 = vpop.xlane.xlu0 %724 }
 0x2f1   :  { %2716 = vrcp.f32 %v725_v47 }
 0x2f4   :  { %v731_v49 = vpop.xlane.xlu0 %730 }
 0x2f5   :  { %2718 = vrcp.f32 %v731_v49  ;;  %v728_v50 = vpop.xlane.xlu1 %727 }
 0x2f6   :  { %2720 = vrcp.f32 %v728_v50 }
 0x2f9   :  { %v734_v51 = vpop.xlane.xlu1 %733 }
 0x2fa   :  { %2722 = vrcp.f32 %v734_v51 }
 0x2fb   :  { %v2717_v52 = vpop.eup %2716 }
 0x2fc   :  { %v736_v53 = vmul.f32 %v2717_v52, %v2709_v37 }
 0x2fe   :  { %743 = vst.msk [vmem:[#allocation4] sm:$0xff] %vm698_vm3, %v736_v53  ;;  %2518 = vmatmul.mubr.msk.f32.vlgmr.msra.gmra.mrb[6].mxu0 %vm698_vm3, %v736_v53 }
 0x2ff   :  { %v2719_v54 = vpop.eup %2718  ;;  %2526 = vmatpush3.msra.mxu0 %v3017_v42  ;;  %2527 = vmatprep.mubr.msk.f32.mxu0 %vm2797_vm1, %v2796_v28 }
 0x300   :  { %v2721_v55 = vpop.eup %2720  ;;  %v740_v58 = vmul.f32 %v2719_v54, %v2711_v39 }
 0x301   :  { %v738_v59 = vmul.f32 %v2721_v55, %v2713_v40 }
 0x302   :  { %745 = vst.msk [vmem:[#allocation4 + $0x10] sm:$0xff] %vm698_vm3, %v740_v58  ;;  %2528 = vmatmul.mubr.msk.f32.vlgmr.msra.gmra.mrb[8].mxu0 %vm698_vm3, %v740_v58 }
 0x303   :  { %744 = vst.msk [vmem:[#allocation4 + $0x8] sm:$0xff] %vm698_vm3, %v738_v59  ;;  %2523 = vmatmul.mubr.msk.f32.vlgmr.msra.gmra.mrb[14].mxu1 %vm698_vm3, %v738_v59 }
 0x304   :  { %v2723_v60 = vpop.eup %2722  ;;  %2531 = vmatpush3.msra.mxu1 %v3015_v41  ;;  %2532 = vmatprep.mubr.msk.f32.mxu1 %vm2797_vm1, %v2796_v28  ;;  %v2661_v41 = vpack.c.bf16 %v1040_v62, %v1039_v61 }
 0x305   :  { %v742_v42 = vmul.f32 %v2723_v60, %v2715_v45  ;;  %2666 = vmatprep.subr.bf16.mxu1 %v2665_v6 }
 0x306   :  { %2662 = vmatprep.subr.bf16.mxu0 %v2661_v41 }
 0x307   :  { %746 = vst.msk [vmem:[#allocation4 + $0x18] sm:$0xff] %vm698_vm3, %v742_v42  ;;  %2533 = vmatmul.mubr.msk.f32.vlgmr.msra.gmra.mrb[16].mxu1 %vm698_vm3, %v742_v42  ;;  %2664 = vmatpush3.bf16.msra.mxu0 %v2661_v41 }
 0x308   :  { %2553 = vmatprep.mubr.msk.f32.mxu1 %vm85_vm0, %v2882_v5  ;;  %2674 = vmatprep.subr.bf16.mxu0 %v2673_v1 }
 0x309   :  { %2668 = vmatpush3.bf16.msra.mxu1 %v2665_v6 }
 0x30a   :  { %2670 = vmatprep.subr.bf16.mxu1 %v2669_v9 }
 0x30d   :  { %2672 = vmatpush3.bf16.msra.mxu1 %v2669_v9 }
 0x30e   :  { %2682 = vmatprep.subr.bf16.mxu1 %v2681_v20 }
 0x310   :  { %2554 = vmatmul.mubr.msk.f32.vlgmr.msra.gmra.mrb[18].mxu1 %vm85_vm0, %v2901_v12 }
 0x311   :  { %2556 = vmatprep.mubr.msk.f32.mxu1 %vm85_vm0, %v2906_v13  ;;  %2684 = vmatpush3.bf16.msra.mxu1 %v2681_v20 }
 0x312   :  { %2686 = vmatprep.subr.bf16.mxu1 %v2685_v22 }
 0x314   :  { %2557 = vmatmul.mubr.msk.f32.gmra.mrb[20].mxu1 %vm85_vm0, %v2915_v15 }
 0x315   :  { %2581 = vmatprep.mubr.msk.f32.mxu1 %vm85_vm0, %v2962_v26  ;;  %2688 = vmatpush3.bf16.msra.mxu1 %v2685_v22  ;;  %v2319_v26 = vld [vmem:[%s3254_s5 + $0x30] sm:$0xff] }
 0x316   :  { %2597 = vmatprep.subr.mxu1 %v2796_v28 }
 0x318   :  { %2582 = vmatmul.mubr.msk.f32.vlgmr.msra.gmra.mrb[22].mxu1 %vm85_vm0, %v2969_v27  ;;  %v2320_v27 = vld [vmem:[%s3254_s5 + $0x38] sm:$0xff] }
 0x319   :  { %2584 = vmatprep.mubr.msk.f32.mxu1 %vm85_vm0, %v2978_v29  ;;  %v2677_v29 = vpack.c.bf16 %v2320_v27, %v2319_v26 }
 0x31c   :  { %2585 = vmatmul.mubr.msk.f32.gmra.mrb[24].mxu1 %vm85_vm0, %v2985_v30 }
 0x31d   :  { %2599 = vmatprep.mubr.msk.f32.mxu1 %vm2797_vm1, %v2796_v28 }
 0x3d1   :  { %v816_v23 = vpop.f32.mrb[6].mxu0 }
 0x3d2   :  { %v2519_v24 = vpop.f32.mrb[7].mxu0  ;;  %2539 = vmatprep.mubr.msk.f32.mxu0 %vm385_vm2, %v816_v23 }
 0x3d5   :  { %v962_v25 = vpop.f32.mrb[8].mxu0 }
 0x3d6   :  { %v889_v31 = vpop.f32.mrb[14].mxu1  ;;  %v2529_v32 = vpop.f32.mrb[9].mxu0 }
 0x3d7   :  { %v2524_v30 = vpop.f32.mrb[15].mxu1  ;;  %2540 = vmatmul.mubr.msk.f32.vlgmr.msra.gmra.mrb[10].mxu0 %vm385_vm2, %v889_v31 }
 0x3d8   :  { %2542 = vmatprep.mubr.msk.f32.mxu0 %vm385_vm2, %v962_v25  ;;  %2676 = vmatpush3.bf16.msra.mxu0 %v2673_v1 }
 0x3d9   :  { %2678 = vmatprep.subr.bf16.mxu0 %v2677_v29 }
 0x3da   :  { %v1035_v33 = vpop.f32.mrb[16].mxu1 }
 0x3db   :  { %v2534_v34 = vpop.f32.mrb[17].mxu1  ;;  %2543 = vmatmul.mubr.msk.f32.gmra.mrb[12].mxu0 %vm385_vm2, %v1035_v33 }
 0x3dc   :  { %2680 = vmatpush3.bf16.msra.mxu0 %v2677_v29  ;;  %2567 = vmatprep.mubr.msk.f32.mxu0 %vm85_vm0, %v2920_v16 }
 0x3dd   :  { %2587 = vmatprep.subr.mxu0 %v2796_v28 }
 0x3df   :  { %2568 = vmatmul.mubr.msk.f32.vlgmr.msra.gmra.mrb[14].mxu0 %vm85_vm0, %v2929_v17 }
 0x3e0   :  { %2570 = vmatprep.mubr.msk.f32.mxu0 %vm85_vm0, %v2934_v18 }
 0x3e3   :  { %2571 = vmatmul.mubr.msk.f32.gmra.mrb[16].mxu0 %vm85_vm0, %v2943_v19  ;;  %v2555_v35 = vpop.f32.mrb[18].mxu1 }
 0x3e4   :  { %2589 = vmatprep.mubr.msk.f32.mxu0 %vm2797_vm1, %v2796_v28  ;;  %v1213_v36 = vpop.f32.mrb[19].mxu1 }
 0x3e7   :  { %v2558_v37 = vpop.f32.mrb[20].mxu1 }
 0x3e8   :  { %v1223_v38 = vpop.f32.mrb[21].mxu1 }
 0x3eb   :  { %v2583_v39 = vpop.f32.mrb[22].mxu1 }
 0x3ec   :  { %v1393_v18 = vpop.f32.mrb[23].mxu1 }
 0x3ef   :  { %v3153_v19 = vpop.f32.mrb[24].mxu1 }
 0x3f0   :  { %v3155_v44 = vpop.f32.mrb[25].mxu1 }
 0x4b2   :  { %v2569_v16 = vpop.f32.mrb[14].mxu0 }
 0x4b3   :  { %v1303_v40 = vpop.f32.mrb[15].mxu0 }
 0x4b4   :  { %2588 = vmatpush3.xpose.msk.msra.mxu0 %vm385_vm2, %v1303_v40  ;;  %v2346_v40 = vld [vmem:[%s3256_s7 + $0x18] sm:$0xff] }
 0x4b5   :  { %2592 = vmatprep.subr.mxu0 %v2796_v28 }
 0x4b6   :  { %v2572_v17 = vpop.f32.mrb[16].mxu0 }
 0x4b7   :  { %v1313_v43 = vpop.f32.mrb[17].mxu0  ;;  %2590 = vmatmul.mubr.msk.f32.vlgmr.msra.gmra.mrb[18].mxu0 %vm385_vm2, %v1213_v36 }
 0x4b8   :  { %2593 = vmatpush3.xpose.msk.msra.mxu0 %vm385_vm2, %v2569_v16  ;;  %2598 = vmatpush3.xpose.msk.msra.mxu1 %vm385_vm2, %v1313_v43  ;;  %v2345_v16 = vld [vmem:[%s3256_s7 + $0x10] sm:$0xff] }
 0x4b9   :  { %2594 = vmatprep.mubr.msk.f32.mxu0 %vm2797_vm1, %v2796_v28  ;;  %2602 = vmatprep.subr.mxu0 %v2796_v28 }
 0x4ba   :  { %2607 = vmatprep.subr.mxu1 %v2796_v28 }
 0x4bb   :  { %2595 = vmatmul.mubr.msk.f32.vlgmr.msra.gmra.mrb[20].mxu0 %vm385_vm2, %v2555_v35  ;;  %2600 = vmatmul.mubr.msk.f32.vlgmr.msra.gmra.mrb[26].mxu1 %vm385_vm2, %v1223_v38 }
 0x4bc   :  { %2603 = vmatpush3.xpose.msk.msra.mxu0 %vm385_vm2, %v2572_v17  ;;  %2604 = vmatprep.mubr.msk.f32.mxu0 %vm2797_vm1, %v2796_v28  ;;  %v2689_v17 = vpack.c.bf16 %v2346_v40, %v2345_v16 }
 0x4bd   :  { %2612 = vmatprep.subr.mxu0 %v2796_v28  ;;  %2609 = vmatprep.mubr.msk.f32.mxu1 %vm2797_vm1, %v2796_v28 }
 0x4be   :  { %2608 = vmatpush3.msra.mxu1 %v1393_v18 }
 0x4bf   :  { %2605 = vmatmul.mubr.msk.f32.vlgmr.msra.gmra.mrb[22].mxu0 %vm385_vm2, %v2558_v37  ;;  %2617 = vmatprep.subr.mxu1 %v2796_v28 }
 0x4c0   :  { %2613 = vmatpush3.msra.mxu0 %v2583_v39  ;;  %2614 = vmatprep.mubr.msk.f32.mxu0 %vm2797_vm1, %v2796_v28 }
 0x4c1   :  { %2622 = vmatprep.subr.mxu0 %v2796_v28 }
 0x58a   :  { %v1484_v45 = vpop.f32.mrb[18].mxu0 }
 0x58b   :  { %v1716_v46 = vmul.f32 0.25, %v1484_v45  ;;  %v2591_v47 = vpop.f32.mrb[19].mxu0 }
 0x58d   :  { %v1720_v49 = vadd.f32 %v1716_v46, %v3022_v48 }
 0x58e   :  { %v1560_v50 = vpop.f32.mrb[20].mxu0  ;;  %v1636_v51 = vpop.f32.mrb[26].mxu1 }
 0x58f   :  { %v1717_v52 = vmul.f32 0.25, %v1560_v50  ;;  %v1718_v53 = vmul.f32 0.25, %v1636_v51  ;;  %v2596_v54 = vpop.f32.mrb[21].mxu0  ;;  %v1724_v55 = vsel %vm698_vm3, %v1720_v49, -inf  ;;  %v2601_v58 = vpop.f32.mrb[27].mxu1 }
 0x590   :  { %1725 = vmax.xlane.f32.xlu0 %v1724_v55 }
 0x591   :  { %v1721_v59 = vadd.f32 %v1717_v52, %v3027_v57  ;;  %v1722_v60 = vadd.f32 %v1718_v53, %v3025_v56 }
 0x592   :  { %v1712_v42 = vpop.f32.mrb[22].mxu0 }
 0x593   :  { %v1719_v61 = vmul.f32 0.25, %v1712_v42  ;;  %v1727_v62 = vsel %vm698_vm3, %v1721_v59, -inf  ;;  %v1730_v41 = vsel %vm698_vm3, %v1722_v60, -inf  ;;  %v2606_v48 = vpop.f32.mrb[23].mxu0 }
 0x594   :  { %1728 = vmax.xlane.f32.xlu1 %v1727_v62  ;;  %1731 = vmax.xlane.f32.xlu0 %v1730_v41 }
 0x595   :  { %v1723_v63 = vadd.f32 %v1719_v61, %v3032_v4 }
 0x597   :  { %v1733_v0 = vsel %vm698_vm3, %v1723_v63, -inf }
 0x598   :  { %1734 = vmax.xlane.f32.xlu1 %v1733_v0 }
 0x61d   :  { %v1726_v1 = vpop.xlane.xlu0 %1725 }
 0x61e   :  { %v1736_v2 = vsub.f32 %v1720_v49, %v1726_v1  ;;  %v2280_v49 = vld [vmem:[%s3257_s8] ss:$0 sm:$0xff]  ;;  %s2798_s8 = smov [#allocation4]  }
 0x61f   :  { %v78_v50 = vadd.f32 %v2280_v49, %v2901_v12  ;;  %v77_v51 = vadd.f32 %v2280_v49, %v2882_v5  ;;  %v80_v55 = vadd.f32 %v2280_v49, %v2915_v15  ;;  %s2265_s20 = sshll.u32 %s2798_s8, 4  ;;  %s2266_s20 = int_to_ptr.vmem [resolvable:$true] %s2265_s20 }
 0x620   :  { %v1740_v3 = vmul.f32 1.442695, %v1736_v2  ;;  %s2748_s21 = scalar_lea.vmem %s2266_s20, 1024  ;;  %p2753_p1 = scmp.lt.s32.totalorder %s2266_s20, %s2266_s20 }
 0x621   :  { %v1729_v57 = vpop.xlane.xlu1 %1728  ;;  %v1732_v6 = vpop.xlane.xlu0 %1731  ;;  %p2749_p0 = scmp.ne.s32.totalorder %s2266_s20, %s2748_s21  ;;  %p2754_p2 = scmp.lt.s32.totalorder %s2748_s21, %s2748_s21 }
 0x622   :  { %2724 = vpow2.f32 %v1740_v3  ;;  %v1737_v56 = vsub.f32 %v1721_v59, %v1729_v57  ;;  %v1738_v7 = vsub.f32 %v1722_v60, %v1732_v6  ;;  %v79_v59 = vadd.f32 %v2280_v49, %v2906_v13 }
 0x623   :  { %p2755_p3 = por %p2754_p2, %p2753_p1 }
 0x624   :  { %v1742_v8 = vmul.f32 1.442695, %v1737_v56  ;;  %v1744_v9 = vmul.f32 1.442695, %v1738_v7 }
 0x625   :  { %v1735_v10 = vpop.xlane.xlu1 %1734  ;;  %p2756_p4 = pnand %p2755_p3, %p2749_p0 }
 0x626   :  { %2726 = vpow2.f32 %v1742_v8  ;;  %v1739_v11 = vsub.f32 %v1723_v63, %v1735_v10 }
 0x627   :  { %2728 = vpow2.f32 %v1744_v9 }
 0x628   :  { %v1746_v14 = vmul.f32 1.442695, %v1739_v11 }
 0x62a   :  { %2730 = vpow2.f32 %v1746_v14 }
 0x62c   :  { %v2725_v4 = vpop.eup %2724 }
 0x62d   :  { %v1748_v20 = vsel %vm698_vm3, %v2725_v4, 0.0 }
 0x62e   :  { %1749 = vadd.xlane.f32.xlu0 %v1748_v20 }
 0x630   :  { %v2727_v21 = vpop.eup %2726 }
 0x631   :  { %v2729_v22 = vpop.eup %2728  ;;  %v1751_v23 = vsel %vm698_vm3, %v2727_v21, 0.0 }
 0x632   :  { %1752 = vadd.xlane.f32.xlu1 %v1751_v23  ;;  %v1754_v24 = vsel %vm698_vm3, %v2729_v22, 0.0 }
 0x633   :  { %1755 = vadd.xlane.f32.xlu0 %v1754_v24 }
 0x634   :  { %v2731_v26 = vpop.eup %2730 }
 0x635   :  { %v1757_v27 = vsel %vm698_vm3, %v2731_v26, 0.0 }
 0x636   :  { %1758 = vadd.xlane.f32.xlu1 %v1757_v27 }
 0x6bb   :  { %v1750_v25 = vpop.xlane.xlu0 %1749 }
 0x6bc   :  { %2732 = vrcp.f32 %v1750_v25 }
 0x6bf   :  { %v1753_v29 = vpop.xlane.xlu1 %1752 }
 0x6c0   :  { %2734 = vrcp.f32 %v1753_v29  ;;  %v1756_v31 = vpop.xlane.xlu0 %1755 }
 0x6c1   :  { %2736 = vrcp.f32 %v1756_v31 }
 0x6c3   :  { %v1759_v32 = vpop.xlane.xlu1 %1758 }
 0x6c4   :  { %2738 = vrcp.f32 %v1759_v32 }
 0x6c6   :  { %v2733_v30 = vpop.eup %2732 }
 0x6c7   :  { %v1761_v33 = vmul.f32 %v2733_v30, %v2725_v4 }
 0x6c9   :  { %1769 = vst.msk [vmem:[#allocation4 + $0x20] sm:$0xff] %vm698_vm3, %v1761_v33  ;;  %2610 = vmatmul.mubr.msk.f32.vlgmr.msra.gmra.mrb[28].mxu1 %vm698_vm3, %v1761_v33 }
 0x6ca   :  { %v2735_v34 = vpop.eup %2734  ;;  %2618 = vmatpush3.msra.mxu1 %v3155_v44  ;;  %2619 = vmatprep.mubr.msk.f32.mxu1 %vm2797_vm1, %v2796_v28 }
 0x6cb   :  { %v2737_v35 = vpop.eup %2736  ;;  %v1763_v36 = vmul.f32 %v2735_v34, %v2727_v21 }
 0x6cc   :  { %v1765_v37 = vmul.f32 %v2737_v35, %v2729_v22 }
 0x6cd   :  { %1770 = vst.msk [vmem:[#allocation4 + $0x28] sm:$0xff] %vm698_vm3, %v1763_v36  ;;  %2615 = vmatmul.mubr.msk.f32.vlgmr.msra.gmra.mrb[24].mxu0 %vm698_vm3, %v1763_v36 }
 0x6ce   :  { %v2739_v38 = vpop.eup %2738  ;;  %1771 = vst.msk [vmem:[#allocation4 + $0x30] sm:$0xff] %vm698_vm3, %v1765_v37  ;;  %2620 = vmatmul.mubr.msk.f32.vlgmr.msra.gmra.mrb[30].mxu1 %vm698_vm3, %v1765_v37  ;;  %2623 = vmatpush3.msra.mxu0 %v3153_v19 }
 0x6cf   :  { %v1767_v39 = vmul.f32 %v2739_v38, %v2731_v26  ;;  %2624 = vmatprep.mubr.msk.f32.mxu0 %vm2797_vm1, %v2796_v28  ;;  %2690 = vmatprep.subr.bf16.mxu0 %v2689_v17 }
 0x6d1   :  { %1772 = vst.msk [vmem:[#allocation4 + $0x38] sm:$0xff] %vm698_vm3, %v1767_v39  ;;  %2625 = vmatmul.mubr.msk.f32.vlgmr.msra.gmra.mrb[26].mxu0 %vm698_vm3, %v1767_v39 }
 0x6d2   :  { %2692 = vmatpush3.bf16.msra.mxu0 %v2689_v17 }
 0x79c   :  { %v1842_v43 = vpop.f32.mrb[28].mxu1 }
 0x79d   :  { %v2611_v18 = vpop.f32.mrb[29].mxu1  ;;  %2631 = vmatprep.mubr.msk.f32.mxu0 %vm385_vm2, %v1842_v43 }
 0x7a0   :  { %v1915_v28 = vpop.f32.mrb[24].mxu0 }
 0x7a1   :  { %v1988_v19 = vpop.f32.mrb[30].mxu1  ;;  %v2616_v44 = vpop.f32.mrb[25].mxu0  ;;  %2632 = vmatmul.mubr.msk.f32.vlgmr.msra.gmra.mrb[10].mxu0 %vm385_vm2, %v1915_v28 }
 0x7a2   :  { %v2621_v45 = vpop.f32.mrb[31].mxu1  ;;  %2634 = vmatprep.mubr.msk.f32.mxu0 %vm385_vm2, %v1988_v19 }
 0x7a4   :  { %v2061_v46 = vpop.f32.mrb[26].mxu0 }
 0x7a5   :  { %v2626_v47 = vpop.f32.mrb[27].mxu0  ;;  %2635 = vmatmul.mubr.msk.f32.gmra.mrb[12].mxu0 %vm385_vm2, %v2061_v46 }
 0x874   :  { %v2633_v52 = vpop.f32.mrb[10].mxu0 }
 0x875   :  { %v2693_v53 = vadd.f32 %v2633_v52, %v78_v50  ;;  %v2146_v54 = vpop.f32.mrb[11].mxu0 }
 0x876   :  { %v2694_v58 = vadd.f32 %v2146_v54, %v77_v51 }
 0x877   :  { %v2172_v60 = vsel %vm85_vm0, %v2693_v53, 0.0 }
 0x878   :  { %2173 = vadd.xlane.f32.xlu1 %v2172_v60  ;;  %v2636_v42 = vpop.f32.mrb[12].mxu0  ;;  %v2169_v61 = vsel %vm85_vm0, %v2694_v58, 0.0 }
 0x879   :  { %v2695_v62 = vadd.f32 %v2636_v42, %v80_v55  ;;  %v2156_v41 = vpop.f32.mrb[13].mxu0  ;;  %2170 = vadd.xlane.f32.xlu0 %v2169_v61 }
 0x87a   :  { %v2696_v12 = vadd.f32 %v2156_v41, %v79_v59 }
 0x87b   :  { %v2178_v5 = vsel %vm85_vm0, %v2695_v62, 0.0 }
 0x87c   :  { %2179 = vadd.xlane.f32.xlu1 %v2178_v5  ;;  %v2175_v48 = vsel %vm85_vm0, %v2696_v12, 0.0 }
 0x87d   :  { %2176 = vadd.xlane.f32.xlu0 %v2175_v48 }
 0x905   :  { %v2174_v15 = vpop.xlane.xlu1 %2173 }
 0x906   :  { %v2183_v63 = vmul.f32 0.03125, %v2174_v15  ;;  %v2171_v0 = vpop.xlane.xlu0 %2170 }
 0x907   :  { %v2182_v13 = vmul.f32 0.03125, %v2171_v0 }
 0x908   :  { %v2187_v1 = vsub.f32 %v2693_v53, %v2183_v63 }
 0x909   :  { %v2186_v2 = vsub.f32 %v2694_v58, %v2182_v13  ;;  %v2180_v3 = vpop.xlane.xlu1 %2179 }
 0x90a   :  { %v2185_v57 = vmul.f32 0.03125, %v2180_v3  ;;  %v2177_v6 = vpop.xlane.xlu0 %2176  ;;  %v2191_v56 = vmul.f32 %v2187_v1, %v2187_v1 }
 0x90b   :  { %v2184_v7 = vmul.f32 0.03125, %v2177_v6  ;;  %v2190_v8 = vmul.f32 %v2186_v2, %v2186_v2 }
 0x90c   :  { %v2189_v9 = vsub.f32 %v2695_v62, %v2185_v57  ;;  %v2197_v10 = vsel %vm85_vm0, %v2191_v56, 0.0 }
 0x90d   :  { %v2188_v11 = vsub.f32 %v2696_v12, %v2184_v7  ;;  %2198 = vadd.xlane.f32.xlu1 %v2197_v10  ;;  %v2194_v14 = vsel %vm85_vm0, %v2190_v8, 0.0 }
 0x90e   :  { %2195 = vadd.xlane.f32.xlu0 %v2194_v14  ;;  %v2193_v4 = vmul.f32 %v2189_v9, %v2189_v9 }
 0x90f   :  { %v2192_v20 = vmul.f32 %v2188_v11, %v2188_v11 }
 0x910   :  { %v2203_v21 = vsel %vm85_vm0, %v2193_v4, 0.0 }
 0x911   :  { %2204 = vadd.xlane.f32.xlu1 %v2203_v21  ;;  %v2200_v22 = vsel %vm85_vm0, %v2192_v20, 0.0 }
 0x912   :  { %2201 = vadd.xlane.f32.xlu0 %v2200_v22 }
 0x913   :  { %2759 = shalt.err (!%p2756_p4)
}
 0x914   :  { %s2760_s23 = scalar_lea.hbm %s3261_s12, 1024 }
 0x915   :  { %p2761_p5 = scmp.ne.s32.totalorder %s3261_s12, %s2760_s23  ;;  %p2764_p6 = scmp.lt.u32.totalorder %s2760_s23, %s3261_s12 }
 0x917   :  { %p2766_p7 = pnand %p2764_p6, %p2761_p5 }
 0x919   :  { %2769 = shalt.err (!%p2766_p7)
}
 0x91a   :  { %s2799_s28 = smov 128   ;;  %s2800_s29 = smov 8   ;;  %v2351_v37 = vld [vmem:[%s3258_s9] ss:$0 sm:$0xff] }
 0x91b   :  { %2271 = dma.vmem_to_hbm [thread:$0]  %s2266_s20, 1024, %s3261_s12, [#allocation5], %s2799_s28, %s2799_s28, %s2800_s29  }
 0x91c   :  { %v2352_v40 = vld [vmem:[%s3259_s10] ss:$0 sm:$0xff]  ;;  %s2801_s6 = smov [#allocation2]  }
 0x91d   :  { %s2253_s9 = sshll.u32 %s2801_s6, 4  ;;  %s2254_s9 = int_to_ptr.vmem [resolvable:$true] %s2253_s9 }
 0x91e   :  { %s2770_s10 = scalar_lea.vmem %s2254_s9, 512  ;;  %p2775_p9 = scmp.lt.s32.totalorder %s2254_s9, %s2254_s9 }
 0x91f   :  { %p2771_p8 = scmp.ne.s32.totalorder %s2254_s9, %s2770_s10  ;;  %p2776_p10 = scmp.lt.s32.totalorder %s2770_s10, %s2770_s10 }
 0x921   :  { %p2777_p11 = por %p2776_p10, %p2775_p9 }
 0x923   :  { %p2778_p12 = pnand %p2777_p11, %p2771_p8 }
 0x99a   :  { %v2199_v23 = vpop.xlane.xlu1 %2198 }
 0x99b   :  { %v2207_v24 = vmul.f32 0.03125, %v2199_v23  ;;  %v2196_v26 = vpop.xlane.xlu0 %2195 }
 0x99c   :  { %v2206_v27 = vmul.f32 0.03125, %v2196_v26 }
 0x99d   :  { %v2211_v25 = vadd.f32 1e-05, %v2207_v24 }
 0x99e   :  { %v2210_v29 = vadd.f32 1e-05, %v2206_v27  ;;  %v2205_v31 = vpop.xlane.xlu1 %2204 }
 0x99f   :  { %2740 = vrsqrt.f32 %v2211_v25  ;;  %v2209_v32 = vmul.f32 0.03125, %v2205_v31  ;;  %v2202_v30 = vpop.xlane.xlu0 %2201 }
 0x9a0   :  { %2742 = vrsqrt.f32 %v2210_v29  ;;  %v2208_v33 = vmul.f32 0.03125, %v2202_v30 }
 0x9a1   :  { %v2213_v34 = vadd.f32 1e-05, %v2209_v32 }
 0x9a2   :  { %v2212_v35 = vadd.f32 1e-05, %v2208_v33 }
 0x9a3   :  { %2744 = vrsqrt.f32 %v2213_v34 }
 0x9a4   :  { %2746 = vrsqrt.f32 %v2212_v35 }
 0x9a9   :  { %v2741_v36 = vpop.eup %2740 }
 0x9aa   :  { %v2743_v38 = vpop.eup %2742  ;;  %v2219_v39 = vmul.f32 %v2741_v36, %v2187_v1 }
 0x9ab   :  { %v2218_v16 = vmul.f32 %v2743_v38, %v2186_v2 }
 0x9ac   :  { %v2230_v17 = vmul.f32 %v2351_v37, %v2219_v39 }
 0x9ad   :  { %v2745_v43 = vpop.eup %2744  ;;  %v2229_v18 = vmul.f32 %v2351_v37, %v2218_v16 }
 0x9ae   :  { %v2747_v28 = vpop.eup %2746  ;;  %v2221_v19 = vmul.f32 %v2745_v43, %v2189_v9  ;;  %v2241_v44 = vadd.f32 %v2352_v40, %v2230_v17 }
 0x9af   :  { %v2220_v45 = vmul.f32 %v2747_v28, %v2188_v11  ;;  %v2240_v46 = vadd.f32 %v2352_v40, %v2229_v18 }
 0x9b0   :  { %v2232_v47 = vmul.f32 %v2351_v37, %v2221_v19  ;;  %2245 = vst.msk [vmem:[#allocation2 + $0x8] sm:$0xff] %vm85_vm0, %v2241_v44 }
 0x9b1   :  { %v2231_v49 = vmul.f32 %v2351_v37, %v2220_v45  ;;  %2244 = vst.msk [vmem:[#allocation2] sm:$0xff] %vm85_vm0, %v2240_v46 }
 0x9b2   :  { %v2243_v50 = vadd.f32 %v2352_v40, %v2232_v47 }
 0x9b3   :  { %v2242_v51 = vadd.f32 %v2352_v40, %v2231_v49 }
 0x9b4   :  { %2247 = vst.msk [vmem:[#allocation2 + $0x18] sm:$0xff] %vm85_vm0, %v2243_v50 }
 0x9b5   :  { %2246 = vst.msk [vmem:[#allocation2 + $0x10] sm:$0xff] %vm85_vm0, %v2242_v51 }
 0x9b6   :  { %2781 = shalt.err (!%p2778_p12)
}
 0x9b7   :  { %s2782_s15 = scalar_lea.hbm %s3260_s11, 512 }
 0x9b8   :  { %p2783_p13 = scmp.ne.s32.totalorder %s3260_s11, %s2782_s15  ;;  %p2786_p0 = scmp.lt.u32.totalorder %s2782_s15, %s3260_s11 }
 0x9ba   :  { %p2788_p1 = pnand %p2786_p0, %p2783_p13 }
 0x9bc   :  { %2791 = shalt.err (!%p2788_p1)
}
 0x9bd   :  { %2259 = dma.vmem_to_hbm [thread:$0]  %s2254_s9, 512, %s3260_s11, [#allocation3], %s2799_s28, %s2799_s28, %s2800_s29  }
 0x9be   :  { %2792 = dma.done.wait [#allocation3], 512  }
 0x9bf   :  { %2793 = vsyncadd [#allocation3], 4294966784 }
 0x9c0   :  { %2794 = dma.done.wait [#allocation5], 1024  }
 0x9c1   :  { %2795 = vsyncadd [#allocation5], 4294966272 }
 0x9c2   :  { %2278 = vsyncpa [#allocation3], 1 }
 0x9c3   :  { %2279 = vsyncpa [#allocation5], 1 }

</bundles_post_ra>
